<compile_context>
chip_gen: v7x
topology: tpu7x:2x2x1
jax: 0.10.0
libtpu: 0.0.40
codegen_flags: <defaults>
</compile_context>

<pallas_src>
import jax
import jax.numpy as jnp
import numpy as np
from jax.experimental import pallas as pl
from jax.experimental.pallas import tpu as pltpu


def _lstm_kernel(x_ref, len_ref, wih_ref, whh_ref, b_ref, wfc_ref, bfc_ref,
                 out_ref, gx_ref):
    """Whole forward pass in one kernel invocation.

    x_ref  : [T*B, E]  time-major inputs, row (t*B + b) == embedded_text[b, t, :]
    len_ref: [B, 1]    int32 sequence lengths
    wih_ref: [E, 4H]   W_ih^T   (PyTorch gate order i, f, g, o)
    whh_ref: [H, 4H]   W_hh^T
    b_ref  : [1, 4H]   b_ih + b_hh
    wfc_ref: [H, C]    W_fc^T
    bfc_ref: [1, C]    b_fc
    out_ref: [B, C]    logits
    gx_ref : [T*B, 4H] f32 scratch holding the hoisted input projection
    """
    H = whh_ref.shape[0]
    B = out_ref.shape[0]
    T = x_ref.shape[0] // B

    # Phase 1: hoisted input projection + bias for all T timesteps (one big MXU matmul,
    # M = T*B instead of T tiny M=B matmuls on the serial critical path).
    gx_ref[...] = (jnp.dot(x_ref[...], wih_ref[...],
                           preferred_element_type=jnp.float32) + b_ref[...])

    whh = whh_ref[...]                       # [H, 4H] — small, lives in vregs across the loop
    lens = len_ref[...]                      # [B, 1] int32
    lane = jax.lax.broadcasted_iota(jnp.int32, (B, 4 * H), 1)
    g_lane = (lane >= 2 * H) & (lane < 3 * H)     # hoisted: JAX does not CSE broadcasts

    def step(t, carry):
        h, c, mx = carry                                            # [B, H] f32 vregs
        row = pl.multiple_of(t * B, B)
        gates = gx_ref[pl.ds(row, B), :] + jnp.dot(
            h, whh, preferred_element_type=jnp.float32)             # [B, 4H]
        sg = jax.nn.sigmoid(gates)                                  # full-vreg EUP push
        th = jnp.tanh(gates)                                        # full-vreg EUP push
        act = jnp.where(g_lane, th, sg)                             # [ i | f | tanh(g) | o ]
        i_g = act[:, 0:H]
        f_g = act[:, H:2 * H]
        g_g = act[:, 2 * H:3 * H]
        o_g = act[:, 3 * H:4 * H]
        c_new = f_g * c + i_g * g_g
        h_new = o_g * jnp.tanh(c_new)
        # pack_padded_sequence semantics: state freezes past each sequence's length;
        # pad_packed_sequence zero-pads outputs and those zeros join the temporal max.
        valid = t < lens                                            # [B, 1] bool
        c_out = jnp.where(valid, c_new, c)
        h_out = jnp.where(valid, h_new, h)
        mx_out = jnp.maximum(mx, jnp.where(valid, h_new, 0.0))
        return h_out, c_out, mx_out

    zeros = jnp.zeros((B, H), jnp.float32)
    init = (zeros, zeros, jnp.full((B, H), -jnp.inf, jnp.float32))
    _, _, mx = jax.lax.fori_loop(0, T, step, init, unroll=True)

    # Final fully-connected projection on the pooled hidden states.
    out_ref[...] = (jnp.dot(mx, wfc_ref[...], preferred_element_type=jnp.float32)
                    + bfc_ref[...])


@jax.jit
def lstm_forward(embedded_text, lengths, w_ih, w_hh, b_ih, b_hh, w_fc, b_fc):
    """embedded_text: [B, T, E] batch-first (PyTorch layout), lengths: [B] ints.

    Returns logits [B, num_classes]; matches LSTM.forward in eval mode.
    """
    B, T, E = embedded_text.shape
    H = w_hh.shape[1]
    C = w_fc.shape[0]

    # Glue (plain JAX): layout change + weight transposition only; all matmuls run in-kernel.
    x2d = (jnp.transpose(embedded_text, (1, 0, 2))          # [T, B, E] time-major
           .reshape(T * B, E).astype(jnp.float32))
    lens_col = lengths.reshape(B, 1).astype(jnp.int32)
    wih = jnp.transpose(w_ih).astype(jnp.float32)           # [E, 4H]
    whh = jnp.transpose(w_hh).astype(jnp.float32)           # [H, 4H]
    bias = (b_ih + b_hh).reshape(1, 4 * H).astype(jnp.float32)
    wfc = jnp.transpose(w_fc).astype(jnp.float32)           # [H, C]
    bfc = b_fc.reshape(1, C).astype(jnp.float32)

    vmem = pl.BlockSpec(memory_space=pltpu.MemorySpace.VMEM)
    # No grid: the whole problem (a few KiB) is VMEM-resident on every TPU generation
    # (far under v7x's 64 MiB), so the recurrence runs in a single kernel invocation.
    return pl.pallas_call(
        _lstm_kernel,
        out_shape=jax.ShapeDtypeStruct((B, C), jnp.float32),
        in_specs=[vmem] * 7,
        out_specs=vmem,
        scratch_shapes=[pltpu.VMEM((T * B, 4 * H), jnp.float32)],
    )(x2d, lens_col, wih, whh, bias, wfc, bfc)


def lstm_reference(embedded_text, lengths, w_ih, w_hh, b_ih, b_hh, w_fc, b_fc):
    """Pure-JAX reference mirroring the PyTorch forward (eval mode)."""
    B, T, E = embedded_text.shape
    H = w_hh.shape[1]
    hp = jax.lax.Precision.HIGHEST
    x_tbe = jnp.transpose(embedded_text, (1, 0, 2))
    mask = (jnp.arange(T)[:, None] < lengths[None, :]).astype(jnp.float32)  # [T, B]
    bias = b_ih + b_hh

    def step(carry, inp):
        h, c = carry
        x_t, m_t = inp
        gates = (jnp.dot(x_t, w_ih.T, precision=hp)
                 + jnp.dot(h, w_hh.T, precision=hp) + bias)
        i_g = jax.nn.sigmoid(gates[:, 0:H])
        f_g = jax.nn.sigmoid(gates[:, H:2 * H])
        g_g = jnp.tanh(gates[:, 2 * H:3 * H])
        o_g = jax.nn.sigmoid(gates[:, 3 * H:4 * H])
        c_new = f_g * c + i_g * g_g
        h_new = o_g * jnp.tanh(c_new)
        m = m_t[:, None]
        c_out = m * c_new + (1 - m) * c
        h_out = m * h_new + (1 - m) * h
        return (h_out, c_out), m * h_new      # padded outputs are zero (pad_packed)

    init = (jnp.zeros((B, H), jnp.float32), jnp.zeros((B, H), jnp.float32))
    _, outs = jax.lax.scan(step, init, (x_tbe, mask))          # [T, B, H]
    pooled = jnp.max(outs, axis=0)                             # max_pool1d over time
    return jnp.dot(pooled, w_fc.T, precision=hp) + b_fc


if __name__ == "__main__":
    B, T, E, H, C = 4, 8, 16, 32, 5

    key = jax.random.PRNGKey(0)
    ks = jax.random.split(key, 8)
    scale = 1.0 / np.sqrt(H)
    w_ih = jax.random.uniform(ks[0], (4 * H, E), jnp.float32, -scale, scale)
    w_hh = jax.random.uniform(ks[1], (4 * H, H), jnp.float32, -scale, scale)
    b_ih = jax.random.uniform(ks[2], (4 * H,), jnp.float32, -scale, scale)
    b_hh = jax.random.uniform(ks[3], (4 * H,), jnp.float32, -scale, scale)
    w_fc = jax.random.uniform(ks[4], (C, H), jnp.float32, -scale, scale)
    b_fc = jax.random.uniform(ks[5], (C,), jnp.float32, -scale, scale)

    embedded_text = jax.random.normal(ks[6], (B, T, E), jnp.float32)
    # sorted-descending lengths with max == T, as pack_padded_sequence expects.
    lengths = jnp.array([8, 6, 5, 3], dtype=jnp.int32)

    logits = lstm_forward(embedded_text, lengths, w_ih, w_hh, b_ih, b_hh, w_fc, b_fc)
    logits = jax.block_until_ready(logits)

    ref = lstm_reference(embedded_text, lengths, w_ih, w_hh, b_ih, b_hh, w_fc, b_fc)
    np.testing.assert_allclose(np.asarray(logits), np.asarray(ref),
                               rtol=2e-3, atol=2e-3)
    print("KERNEL_OK")
</pallas_src>

<mosaic_0001>
module attributes {stable_mosaic.version = 11 : i64} {
  func.func @_lstm_kernel(%arg0: memref<32x16xf32, #tpu.memory_space<vmem>>, %arg1: memref<4x1xi32, #tpu.memory_space<vmem>>, %arg2: memref<16x128xf32, #tpu.memory_space<vmem>>, %arg3: memref<32x128xf32, #tpu.memory_space<vmem>>, %arg4: memref<1x128xf32, #tpu.memory_space<vmem>>, %arg5: memref<32x5xf32, #tpu.memory_space<vmem>>, %arg6: memref<1x5xf32, #tpu.memory_space<vmem>>, %arg7: memref<4x5xf32, #tpu.memory_space<vmem>>, %arg8: memref<32x128xf32, #tpu.memory_space<vmem>>) attributes {dimension_semantics = [], scalar_prefetch = 0 : i64, scratch_operands = 1 : i64, tpu.core_type = #tpu.core_type<tc>} {
    %c0 = arith.constant 0 : index
    %c0_0 = arith.constant 0 : index
    %0 = vector.load %arg0[%c0, %c0_0] : memref<32x16xf32, #tpu.memory_space<vmem>>, vector<32x16xf32>
    %c0_1 = arith.constant 0 : index
    %c0_2 = arith.constant 0 : index
    %1 = vector.load %arg2[%c0_1, %c0_2] : memref<16x128xf32, #tpu.memory_space<vmem>>, vector<16x128xf32>
    %cst = arith.constant dense<0.000000e+00> : vector<32x128xf32>
    %2 = tpu.matmul %0, %1, %cst {dimension_numbers = #tpu.dot_dimension_numbers<[1], [0], [0], [1], [0, 0, 1, 1], [], []>} : vector<32x16xf32>, vector<16x128xf32>, vector<32x128xf32> -> vector<32x128xf32>
    %c0_3 = arith.constant 0 : index
    %c0_4 = arith.constant 0 : index
    %3 = vector.load %arg4[%c0_3, %c0_4] : memref<1x128xf32, #tpu.memory_space<vmem>>, vector<1x128xf32>
    %4 = vector.broadcast %3 : vector<1x128xf32> to vector<32x128xf32>
    %5 = arith.addf %2, %4 : vector<32x128xf32>
    %c0_5 = arith.constant 0 : index
    %c0_6 = arith.constant 0 : index
    %6 = vector.load %arg8[%c0_5, %c0_6] : memref<32x128xf32, #tpu.memory_space<vmem>>, vector<32x128xf32>
    tpu.vector_store %arg8[%c0_5, %c0_6], %5 {strides = array<i32>} : memref<32x128xf32, #tpu.memory_space<vmem>>, vector<32x128xf32>,
    %c0_7 = arith.constant 0 : index
    %c0_8 = arith.constant 0 : index
    %7 = vector.load %arg3[%c0_7, %c0_8] : memref<32x128xf32, #tpu.memory_space<vmem>>, vector<32x128xf32>
    %c0_9 = arith.constant 0 : index
    %c0_10 = arith.constant 0 : index
    %8 = vector.load %arg1[%c0_9, %c0_10] : memref<4x1xi32, #tpu.memory_space<vmem>>, vector<4x1xi32>
    %9 = tpu.iota {dimensions = array<i32: 1>} : vector<4x128xi32>
    %c64_i32 = arith.constant 64 : i32
    %10 = vector.broadcast %c64_i32 : i32 to vector<4x128xi32>
    %11 = arith.cmpi sge, %9, %10 : vector<4x128xi32>
    %c96_i32 = arith.constant 96 : i32
    %12 = vector.broadcast %c96_i32 : i32 to vector<4x128xi32>
    %13 = arith.cmpi slt, %9, %12 : vector<4x128xi32>
    %14 = arith.andi %11, %13 : vector<4x128xi1>
    %cst_11 = arith.constant 0.000000e+00 : f32
    %15 = vector.broadcast %cst_11 : f32 to vector<4x32xf32>
    %cst_12 = arith.constant 0xFF800000 : f32
    %16 = vector.broadcast %cst_12 : f32 to vector<4x32xf32>
    %c0_i32 = arith.constant 0 : i32
    %c4_i32 = arith.constant 4 : i32
    %17 = arith.muli %c0_i32, %c4_i32 : i32
    %18 = tpu.assume_multiple %17, 4 : i32
    %19 = arith.index_cast %18 : i32 to index
    %c0_13 = arith.constant 0 : index
    %20 = vector.load %arg8[%19, %c0_13] : memref<32x128xf32, #tpu.memory_space<vmem>>, vector<4x128xf32>
    %cst_14 = arith.constant dense<0.000000e+00> : vector<4x128xf32>
    %21 = tpu.matmul %15, %7, %cst_14 {dimension_numbers = #tpu.dot_dimension_numbers<[1], [0], [0], [1], [0, 0, 1, 1], [], []>} : vector<4x32xf32>, vector<32x128xf32>, vector<4x128xf32> -> vector<4x128xf32>
    %22 = arith.addf %20, %21 : vector<4x128xf32>
    %23 = arith.negf %22 : vector<4x128xf32>
    %24 = math.exp %23 : vector<4x128xf32>
    %cst_15 = arith.constant 1.000000e+00 : f32
    %25 = vector.broadcast %cst_15 : f32 to vector<4x128xf32>
    %26 = arith.addf %25, %24 : vector<4x128xf32>
    %27 = arith.divf %25, %26 : vector<4x128xf32>
    %28 = math.tanh %22 : vector<4x128xf32>
    %29 = arith.select %14, %28, %27 : vector<4x128xi1>, vector<4x128xf32>
    %30 = vector.extract_strided_slice %29 {offsets = [0, 0], sizes = [4, 32], strides = [1, 1]} : vector<4x128xf32> to vector<4x32xf32>
    %31 = vector.extract_strided_slice %29 {offsets = [0, 32], sizes = [4, 32], strides = [1, 1]} : vector<4x128xf32> to vector<4x32xf32>
    %32 = vector.extract_strided_slice %29 {offsets = [0, 64], sizes = [4, 32], strides = [1, 1]} : vector<4x128xf32> to vector<4x32xf32>
    %33 = vector.extract_strided_slice %29 {offsets = [0, 96], sizes = [4, 32], strides = [1, 1]} : vector<4x128xf32> to vector<4x32xf32>
    %34 = arith.mulf %31, %15 : vector<4x32xf32>
    %35 = arith.mulf %30, %32 : vector<4x32xf32>
    %36 = arith.addf %34, %35 : vector<4x32xf32>
    %37 = math.tanh %36 : vector<4x32xf32>
    %38 = arith.mulf %33, %37 : vector<4x32xf32>
    %39 = vector.broadcast %c0_i32 : i32 to vector<4x1xi32>
    %40 = arith.cmpi slt, %39, %8 : vector<4x1xi32>
    %41 = vector.shape_cast %40 : vector<4x1xi1> to vector<4x1xi1>
    %42 = vector.broadcast %41 : vector<4x1xi1> to vector<4x32xi1>
    %43 = arith.select %42, %36, %15 : vector<4x32xi1>, vector<4x32xf32>
    %44 = vector.shape_cast %40 : vector<4x1xi1> to vector<4x1xi1>
    %45 = vector.broadcast %44 : vector<4x1xi1> to vector<4x32xi1>
    %46 = arith.select %45, %38, %15 : vector<4x32xi1>, vector<4x32xf32>
    %cst_16 = arith.constant 0.000000e+00 : f32
    %47 = vector.shape_cast %40 : vector<4x1xi1> to vector<4x1xi1>
    %48 = vector.broadcast %47 : vector<4x1xi1> to vector<4x32xi1>
    %49 = vector.broadcast %cst_16 : f32 to vector<4x32xf32>
    %50 = arith.select %48, %38, %49 : vector<4x32xi1>, vector<4x32xf32>
    %51 = arith.maximumf %16, %50 : vector<4x32xf32>
    %c1_i32 = arith.constant 1 : i32
    %c4_i32_17 = arith.constant 4 : i32
    %52 = arith.muli %c1_i32, %c4_i32_17 : i32
    %53 = tpu.assume_multiple %52, 4 : i32
    %54 = arith.index_cast %53 : i32 to index
    %c0_18 = arith.constant 0 : index
    %55 = vector.load %arg8[%54, %c0_18] : memref<32x128xf32, #tpu.memory_space<vmem>>, vector<4x128xf32>
    %cst_19 = arith.constant dense<0.000000e+00> : vector<4x128xf32>
    %56 = tpu.matmul %46, %7, %cst_19 {dimension_numbers = #tpu.dot_dimension_numbers<[1], [0], [0], [1], [0, 0, 1, 1], [], []>} : vector<4x32xf32>, vector<32x128xf32>, vector<4x128xf32> -> vector<4x128xf32>
    %57 = arith.addf %55, %56 : vector<4x128xf32>
    %58 = arith.negf %57 : vector<4x128xf32>
    %59 = math.exp %58 : vector<4x128xf32>
    %cst_20 = arith.constant 1.000000e+00 : f32
    %60 = vector.broadcast %cst_20 : f32 to vector<4x128xf32>
    %61 = arith.addf %60, %59 : vector<4x128xf32>
    %62 = arith.divf %60, %61 : vector<4x128xf32>
    %63 = math.tanh %57 : vector<4x128xf32>
    %64 = arith.select %14, %63, %62 : vector<4x128xi1>, vector<4x128xf32>
    %65 = vector.extract_strided_slice %64 {offsets = [0, 0], sizes = [4, 32], strides = [1, 1]} : vector<4x128xf32> to vector<4x32xf32>
    %66 = vector.extract_strided_slice %64 {offsets = [0, 32], sizes = [4, 32], strides = [1, 1]} : vector<4x128xf32> to vector<4x32xf32>
    %67 = vector.extract_strided_slice %64 {offsets = [0, 64], sizes = [4, 32], strides = [1, 1]} : vector<4x128xf32> to vector<4x32xf32>
    %68 = vector.extract_strided_slice %64 {offsets = [0, 96], sizes = [4, 32], strides = [1, 1]} : vector<4x128xf32> to vector<4x32xf32>
    %69 = arith.mulf %66, %43 : vector<4x32xf32>
    %70 = arith.mulf %65, %67 : vector<4x32xf32>
    %71 = arith.addf %69, %70 : vector<4x32xf32>
    %72 = math.tanh %71 : vector<4x32xf32>
    %73 = arith.mulf %68, %72 : vector<4x32xf32>
    %74 = vector.broadcast %c1_i32 : i32 to vector<4x1xi32>
    %75 = arith.cmpi slt, %74, %8 : vector<4x1xi32>
    %76 = vector.shape_cast %75 : vector<4x1xi1> to vector<4x1xi1>
    %77 = vector.broadcast %76 : vector<4x1xi1> to vector<4x32xi1>
    %78 = arith.select %77, %71, %43 : vector<4x32xi1>, vector<4x32xf32>
    %79 = vector.shape_cast %75 : vector<4x1xi1> to vector<4x1xi1>
    %80 = vector.broadcast %79 : vector<4x1xi1> to vector<4x32xi1>
    %81 = arith.select %80, %73, %46 : vector<4x32xi1>, vector<4x32xf32>
    %cst_21 = arith.constant 0.000000e+00 : f32
    %82 = vector.shape_cast %75 : vector<4x1xi1> to vector<4x1xi1>
    %83 = vector.broadcast %82 : vector<4x1xi1> to vector<4x32xi1>
    %84 = vector.broadcast %cst_21 : f32 to vector<4x32xf32>
    %85 = arith.select %83, %73, %84 : vector<4x32xi1>, vector<4x32xf32>
    %86 = arith.maximumf %51, %85 : vector<4x32xf32>
    %c2_i32 = arith.constant 2 : i32
    %c4_i32_22 = arith.constant 4 : i32
    %87 = arith.muli %c2_i32, %c4_i32_22 : i32
    %88 = tpu.assume_multiple %87, 4 : i32
    %89 = arith.index_cast %88 : i32 to index
    %c0_23 = arith.constant 0 : index
    %90 = vector.load %arg8[%89, %c0_23] : memref<32x128xf32, #tpu.memory_space<vmem>>, vector<4x128xf32>
    %cst_24 = arith.constant dense<0.000000e+00> : vector<4x128xf32>
    %91 = tpu.matmul %81, %7, %cst_24 {dimension_numbers = #tpu.dot_dimension_numbers<[1], [0], [0], [1], [0, 0, 1, 1], [], []>} : vector<4x32xf32>, vector<32x128xf32>, vector<4x128xf32> -> vector<4x128xf32>
    %92 = arith.addf %90, %91 : vector<4x128xf32>
    %93 = arith.negf %92 : vector<4x128xf32>
    %94 = math.exp %93 : vector<4x128xf32>
    %cst_25 = arith.constant 1.000000e+00 : f32
    %95 = vector.broadcast %cst_25 : f32 to vector<4x128xf32>
    %96 = arith.addf %95, %94 : vector<4x128xf32>
    %97 = arith.divf %95, %96 : vector<4x128xf32>
    %98 = math.tanh %92 : vector<4x128xf32>
    %99 = arith.select %14, %98, %97 : vector<4x128xi1>, vector<4x128xf32>
    %100 = vector.extract_strided_slice %99 {offsets = [0, 0], sizes = [4, 32], strides = [1, 1]} : vector<4x128xf32> to vector<4x32xf32>
    %101 = vector.extract_strided_slice %99 {offsets = [0, 32], sizes = [4, 32], strides = [1, 1]} : vector<4x128xf32> to vector<4x32xf32>
    %102 = vector.extract_strided_slice %99 {offsets = [0, 64], sizes = [4, 32], strides = [1, 1]} : vector<4x128xf32> to vector<4x32xf32>
    %103 = vector.extract_strided_slice %99 {offsets = [0, 96], sizes = [4, 32], strides = [1, 1]} : vector<4x128xf32> to vector<4x32xf32>
    %104 = arith.mulf %101, %78 : vector<4x32xf32>
    %105 = arith.mulf %100, %102 : vector<4x32xf32>
    %106 = arith.addf %104, %105 : vector<4x32xf32>
    %107 = math.tanh %106 : vector<4x32xf32>
    %108 = arith.mulf %103, %107 : vector<4x32xf32>
    %109 = vector.broadcast %c2_i32 : i32 to vector<4x1xi32>
    %110 = arith.cmpi slt, %109, %8 : vector<4x1xi32>
    %111 = vector.shape_cast %110 : vector<4x1xi1> to vector<4x1xi1>
    %112 = vector.broadcast %111 : vector<4x1xi1> to vector<4x32xi1>
    %113 = arith.select %112, %106, %78 : vector<4x32xi1>, vector<4x32xf32>
    %114 = vector.shape_cast %110 : vector<4x1xi1> to vector<4x1xi1>
    %115 = vector.broadcast %114 : vector<4x1xi1> to vector<4x32xi1>
    %116 = arith.select %115, %108, %81 : vector<4x32xi1>, vector<4x32xf32>
    %cst_26 = arith.constant 0.000000e+00 : f32
    %117 = vector.shape_cast %110 : vector<4x1xi1> to vector<4x1xi1>
    %118 = vector.broadcast %117 : vector<4x1xi1> to vector<4x32xi1>
    %119 = vector.broadcast %cst_26 : f32 to vector<4x32xf32>
    %120 = arith.select %118, %108, %119 : vector<4x32xi1>, vector<4x32xf32>
    %121 = arith.maximumf %86, %120 : vector<4x32xf32>
    %c3_i32 = arith.constant 3 : i32
    %c4_i32_27 = arith.constant 4 : i32
    %122 = arith.muli %c3_i32, %c4_i32_27 : i32
    %123 = tpu.assume_multiple %122, 4 : i32
    %124 = arith.index_cast %123 : i32 to index
    %c0_28 = arith.constant 0 : index
    %125 = vector.load %arg8[%124, %c0_28] : memref<32x128xf32, #tpu.memory_space<vmem>>, vector<4x128xf32>
    %cst_29 = arith.constant dense<0.000000e+00> : vector<4x128xf32>
    %126 = tpu.matmul %116, %7, %cst_29 {dimension_numbers = #tpu.dot_dimension_numbers<[1], [0], [0], [1], [0, 0, 1, 1], [], []>} : vector<4x32xf32>, vector<32x128xf32>, vector<4x128xf32> -> vector<4x128xf32>
    %127 = arith.addf %125, %126 : vector<4x128xf32>
    %128 = arith.negf %127 : vector<4x128xf32>
    %129 = math.exp %128 : vector<4x128xf32>
    %cst_30 = arith.constant 1.000000e+00 : f32
    %130 = vector.broadcast %cst_30 : f32 to vector<4x128xf32>
    %131 = arith.addf %130, %129 : vector<4x128xf32>
    %132 = arith.divf %130, %131 : vector<4x128xf32>
    %133 = math.tanh %127 : vector<4x128xf32>
    %134 = arith.select %14, %133, %132 : vector<4x128xi1>, vector<4x128xf32>
    %135 = vector.extract_strided_slice %134 {offsets = [0, 0], sizes = [4, 32], strides = [1, 1]} : vector<4x128xf32> to vector<4x32xf32>
    %136 = vector.extract_strided_slice %134 {offsets = [0, 32], sizes = [4, 32], strides = [1, 1]} : vector<4x128xf32> to vector<4x32xf32>
    %137 = vector.extract_strided_slice %134 {offsets = [0, 64], sizes = [4, 32], strides = [1, 1]} : vector<4x128xf32> to vector<4x32xf32>
    %138 = vector.extract_strided_slice %134 {offsets = [0, 96], sizes = [4, 32], strides = [1, 1]} : vector<4x128xf32> to vector<4x32xf32>
    %139 = arith.mulf %136, %113 : vector<4x32xf32>
    %140 = arith.mulf %135, %137 : vector<4x32xf32>
    %141 = arith.addf %139, %140 : vector<4x32xf32>
    %142 = math.tanh %141 : vector<4x32xf32>
    %143 = arith.mulf %138, %142 : vector<4x32xf32>
    %144 = vector.broadcast %c3_i32 : i32 to vector<4x1xi32>
    %145 = arith.cmpi slt, %144, %8 : vector<4x1xi32>
    %146 = vector.shape_cast %145 : vector<4x1xi1> to vector<4x1xi1>
    %147 = vector.broadcast %146 : vector<4x1xi1> to vector<4x32xi1>
    %148 = arith.select %147, %141, %113 : vector<4x32xi1>, vector<4x32xf32>
    %149 = vector.shape_cast %145 : vector<4x1xi1> to vector<4x1xi1>
    %150 = vector.broadcast %149 : vector<4x1xi1> to vector<4x32xi1>
    %151 = arith.select %150, %143, %116 : vector<4x32xi1>, vector<4x32xf32>
    %cst_31 = arith.constant 0.000000e+00 : f32
    %152 = vector.shape_cast %145 : vector<4x1xi1> to vector<4x1xi1>
    %153 = vector.broadcast %152 : vector<4x1xi1> to vector<4x32xi1>
    %154 = vector.broadcast %cst_31 : f32 to vector<4x32xf32>
    %155 = arith.select %153, %143, %154 : vector<4x32xi1>, vector<4x32xf32>
    %156 = arith.maximumf %121, %155 : vector<4x32xf32>
    %c4_i32_32 = arith.constant 4 : i32
    %c4_i32_33 = arith.constant 4 : i32
    %157 = arith.muli %c4_i32_32, %c4_i32_33 : i32
    %158 = tpu.assume_multiple %157, 4 : i32
    %159 = arith.index_cast %158 : i32 to index
    %c0_34 = arith.constant 0 : index
    %160 = vector.load %arg8[%159, %c0_34] : memref<32x128xf32, #tpu.memory_space<vmem>>, vector<4x128xf32>
    %cst_35 = arith.constant dense<0.000000e+00> : vector<4x128xf32>
    %161 = tpu.matmul %151, %7, %cst_35 {dimension_numbers = #tpu.dot_dimension_numbers<[1], [0], [0], [1], [0, 0, 1, 1], [], []>} : vector<4x32xf32>, vector<32x128xf32>, vector<4x128xf32> -> vector<4x128xf32>
    %162 = arith.addf %160, %161 : vector<4x128xf32>
    %163 = arith.negf %162 : vector<4x128xf32>
    %164 = math.exp %163 : vector<4x128xf32>
    %cst_36 = arith.constant 1.000000e+00 : f32
    %165 = vector.broadcast %cst_36 : f32 to vector<4x128xf32>
    %166 = arith.addf %165, %164 : vector<4x128xf32>
    %167 = arith.divf %165, %166 : vector<4x128xf32>
    %168 = math.tanh %162 : vector<4x128xf32>
    %169 = arith.select %14, %168, %167 : vector<4x128xi1>, vector<4x128xf32>
    %170 = vector.extract_strided_slice %169 {offsets = [0, 0], sizes = [4, 32], strides = [1, 1]} : vector<4x128xf32> to vector<4x32xf32>
    %171 = vector.extract_strided_slice %169 {offsets = [0, 32], sizes = [4, 32], strides = [1, 1]} : vector<4x128xf32> to vector<4x32xf32>
    %172 = vector.extract_strided_slice %169 {offsets = [0, 64], sizes = [4, 32], strides = [1, 1]} : vector<4x128xf32> to vector<4x32xf32>
    %173 = vector.extract_strided_slice %169 {offsets = [0, 96], sizes = [4, 32], strides = [1, 1]} : vector<4x128xf32> to vector<4x32xf32>
    %174 = arith.mulf %171, %148 : vector<4x32xf32>
    %175 = arith.mulf %170, %172 : vector<4x32xf32>
    %176 = arith.addf %174, %175 : vector<4x32xf32>
    %177 = math.tanh %176 : vector<4x32xf32>
    %178 = arith.mulf %173, %177 : vector<4x32xf32>
    %179 = vector.broadcast %c4_i32_32 : i32 to vector<4x1xi32>
    %180 = arith.cmpi slt, %179, %8 : vector<4x1xi32>
    %181 = vector.shape_cast %180 : vector<4x1xi1> to vector<4x1xi1>
    %182 = vector.broadcast %181 : vector<4x1xi1> to vector<4x32xi1>
    %183 = arith.select %182, %176, %148 : vector<4x32xi1>, vector<4x32xf32>
    %184 = vector.shape_cast %180 : vector<4x1xi1> to vector<4x1xi1>
    %185 = vector.broadcast %184 : vector<4x1xi1> to vector<4x32xi1>
    %186 = arith.select %185, %178, %151 : vector<4x32xi1>, vector<4x32xf32>
    %cst_37 = arith.constant 0.000000e+00 : f32
    %187 = vector.shape_cast %180 : vector<4x1xi1> to vector<4x1xi1>
    %188 = vector.broadcast %187 : vector<4x1xi1> to vector<4x32xi1>
    %189 = vector.broadcast %cst_37 : f32 to vector<4x32xf32>
    %190 = arith.select %188, %178, %189 : vector<4x32xi1>, vector<4x32xf32>
    %191 = arith.maximumf %156, %190 : vector<4x32xf32>
    %c5_i32 = arith.constant 5 : i32
    %c4_i32_38 = arith.constant 4 : i32
    %192 = arith.muli %c5_i32, %c4_i32_38 : i32
    %193 = tpu.assume_multiple %192, 4 : i32
    %194 = arith.index_cast %193 : i32 to index
    %c0_39 = arith.constant 0 : index
    %195 = vector.load %arg8[%194, %c0_39] : memref<32x128xf32, #tpu.memory_space<vmem>>, vector<4x128xf32>
    %cst_40 = arith.constant dense<0.000000e+00> : vector<4x128xf32>
    %196 = tpu.matmul %186, %7, %cst_40 {dimension_numbers = #tpu.dot_dimension_numbers<[1], [0], [0], [1], [0, 0, 1, 1], [], []>} : vector<4x32xf32>, vector<32x128xf32>, vector<4x128xf32> -> vector<4x128xf32>
    %197 = arith.addf %195, %196 : vector<4x128xf32>
    %198 = arith.negf %197 : vector<4x128xf32>
    %199 = math.exp %198 : vector<4x128xf32>
    %cst_41 = arith.constant 1.000000e+00 : f32
    %200 = vector.broadcast %cst_41 : f32 to vector<4x128xf32>
    %201 = arith.addf %200, %199 : vector<4x128xf32>
    %202 = arith.divf %200, %201 : vector<4x128xf32>
    %203 = math.tanh %197 : vector<4x128xf32>
    %204 = arith.select %14, %203, %202 : vector<4x128xi1>, vector<4x128xf32>
    %205 = vector.extract_strided_slice %204 {offsets = [0, 0], sizes = [4, 32], strides = [1, 1]} : vector<4x128xf32> to vector<4x32xf32>
    %206 = vector.extract_strided_slice %204 {offsets = [0, 32], sizes = [4, 32], strides = [1, 1]} : vector<4x128xf32> to vector<4x32xf32>
    %207 = vector.extract_strided_slice %204 {offsets = [0, 64], sizes = [4, 32], strides = [1, 1]} : vector<4x128xf32> to vector<4x32xf32>
    %208 = vector.extract_strided_slice %204 {offsets = [0, 96], sizes = [4, 32], strides = [1, 1]} : vector<4x128xf32> to vector<4x32xf32>
    %209 = arith.mulf %206, %183 : vector<4x32xf32>
    %210 = arith.mulf %205, %207 : vector<4x32xf32>
    %211 = arith.addf %209, %210 : vector<4x32xf32>
    %212 = math.tanh %211 : vector<4x32xf32>
    %213 = arith.mulf %208, %212 : vector<4x32xf32>
    %214 = vector.broadcast %c5_i32 : i32 to vector<4x1xi32>
    %215 = arith.cmpi slt, %214, %8 : vector<4x1xi32>
    %216 = vector.shape_cast %215 : vector<4x1xi1> to vector<4x1xi1>
    %217 = vector.broadcast %216 : vector<4x1xi1> to vector<4x32xi1>
    %218 = arith.select %217, %211, %183 : vector<4x32xi1>, vector<4x32xf32>
    %219 = vector.shape_cast %215 : vector<4x1xi1> to vector<4x1xi1>
    %220 = vector.broadcast %219 : vector<4x1xi1> to vector<4x32xi1>
    %221 = arith.select %220, %213, %186 : vector<4x32xi1>, vector<4x32xf32>
    %cst_42 = arith.constant 0.000000e+00 : f32
    %222 = vector.shape_cast %215 : vector<4x1xi1> to vector<4x1xi1>
    %223 = vector.broadcast %222 : vector<4x1xi1> to vector<4x32xi1>
    %224 = vector.broadcast %cst_42 : f32 to vector<4x32xf32>
    %225 = arith.select %223, %213, %224 : vector<4x32xi1>, vector<4x32xf32>
    %226 = arith.maximumf %191, %225 : vector<4x32xf32>
    %c6_i32 = arith.constant 6 : i32
    %c4_i32_43 = arith.constant 4 : i32
    %227 = arith.muli %c6_i32, %c4_i32_43 : i32
    %228 = tpu.assume_multiple %227, 4 : i32
    %229 = arith.index_cast %228 : i32 to index
    %c0_44 = arith.constant 0 : index
    %230 = vector.load %arg8[%229, %c0_44] : memref<32x128xf32, #tpu.memory_space<vmem>>, vector<4x128xf32>
    %cst_45 = arith.constant dense<0.000000e+00> : vector<4x128xf32>
    %231 = tpu.matmul %221, %7, %cst_45 {dimension_numbers = #tpu.dot_dimension_numbers<[1], [0], [0], [1], [0, 0, 1, 1], [], []>} : vector<4x32xf32>, vector<32x128xf32>, vector<4x128xf32> -> vector<4x128xf32>
    %232 = arith.addf %230, %231 : vector<4x128xf32>
    %233 = arith.negf %232 : vector<4x128xf32>
    %234 = math.exp %233 : vector<4x128xf32>
    %cst_46 = arith.constant 1.000000e+00 : f32
    %235 = vector.broadcast %cst_46 : f32 to vector<4x128xf32>
    %236 = arith.addf %235, %234 : vector<4x128xf32>
    %237 = arith.divf %235, %236 : vector<4x128xf32>
    %238 = math.tanh %232 : vector<4x128xf32>
    %239 = arith.select %14, %238, %237 : vector<4x128xi1>, vector<4x128xf32>
    %240 = vector.extract_strided_slice %239 {offsets = [0, 0], sizes = [4, 32], strides = [1, 1]} : vector<4x128xf32> to vector<4x32xf32>
    %241 = vector.extract_strided_slice %239 {offsets = [0, 32], sizes = [4, 32], strides = [1, 1]} : vector<4x128xf32> to vector<4x32xf32>
    %242 = vector.extract_strided_slice %239 {offsets = [0, 64], sizes = [4, 32], strides = [1, 1]} : vector<4x128xf32> to vector<4x32xf32>
    %243 = vector.extract_strided_slice %239 {offsets = [0, 96], sizes = [4, 32], strides = [1, 1]} : vector<4x128xf32> to vector<4x32xf32>
    %244 = arith.mulf %241, %218 : vector<4x32xf32>
    %245 = arith.mulf %240, %242 : vector<4x32xf32>
    %246 = arith.addf %244, %245 : vector<4x32xf32>
    %247 = math.tanh %246 : vector<4x32xf32>
    %248 = arith.mulf %243, %247 : vector<4x32xf32>
    %249 = vector.broadcast %c6_i32 : i32 to vector<4x1xi32>
    %250 = arith.cmpi slt, %249, %8 : vector<4x1xi32>
    %251 = vector.shape_cast %250 : vector<4x1xi1> to vector<4x1xi1>
    %252 = vector.broadcast %251 : vector<4x1xi1> to vector<4x32xi1>
    %253 = arith.select %252, %246, %218 : vector<4x32xi1>, vector<4x32xf32>
    %254 = vector.shape_cast %250 : vector<4x1xi1> to vector<4x1xi1>
    %255 = vector.broadcast %254 : vector<4x1xi1> to vector<4x32xi1>
    %256 = arith.select %255, %248, %221 : vector<4x32xi1>, vector<4x32xf32>
    %cst_47 = arith.constant 0.000000e+00 : f32
    %257 = vector.shape_cast %250 : vector<4x1xi1> to vector<4x1xi1>
    %258 = vector.broadcast %257 : vector<4x1xi1> to vector<4x32xi1>
    %259 = vector.broadcast %cst_47 : f32 to vector<4x32xf32>
    %260 = arith.select %258, %248, %259 : vector<4x32xi1>, vector<4x32xf32>
    %261 = arith.maximumf %226, %260 : vector<4x32xf32>
    %c7_i32 = arith.constant 7 : i32
    %c4_i32_48 = arith.constant 4 : i32
    %262 = arith.muli %c7_i32, %c4_i32_48 : i32
    %263 = tpu.assume_multiple %262, 4 : i32
    %264 = arith.index_cast %263 : i32 to index
    %c0_49 = arith.constant 0 : index
    %265 = vector.load %arg8[%264, %c0_49] : memref<32x128xf32, #tpu.memory_space<vmem>>, vector<4x128xf32>
    %cst_50 = arith.constant dense<0.000000e+00> : vector<4x128xf32>
    %266 = tpu.matmul %256, %7, %cst_50 {dimension_numbers = #tpu.dot_dimension_numbers<[1], [0], [0], [1], [0, 0, 1, 1], [], []>} : vector<4x32xf32>, vector<32x128xf32>, vector<4x128xf32> -> vector<4x128xf32>
    %267 = arith.addf %265, %266 : vector<4x128xf32>
    %268 = arith.negf %267 : vector<4x128xf32>
    %269 = math.exp %268 : vector<4x128xf32>
    %cst_51 = arith.constant 1.000000e+00 : f32
    %270 = vector.broadcast %cst_51 : f32 to vector<4x128xf32>
    %271 = arith.addf %270, %269 : vector<4x128xf32>
    %272 = arith.divf %270, %271 : vector<4x128xf32>
    %273 = math.tanh %267 : vector<4x128xf32>
    %274 = arith.select %14, %273, %272 : vector<4x128xi1>, vector<4x128xf32>
    %275 = vector.extract_strided_slice %274 {offsets = [0, 0], sizes = [4, 32], strides = [1, 1]} : vector<4x128xf32> to vector<4x32xf32>
    %276 = vector.extract_strided_slice %274 {offsets = [0, 32], sizes = [4, 32], strides = [1, 1]} : vector<4x128xf32> to vector<4x32xf32>
    %277 = vector.extract_strided_slice %274 {offsets = [0, 64], sizes = [4, 32], strides = [1, 1]} : vector<4x128xf32> to vector<4x32xf32>
    %278 = vector.extract_strided_slice %274 {offsets = [0, 96], sizes = [4, 32], strides = [1, 1]} : vector<4x128xf32> to vector<4x32xf32>
    %279 = arith.mulf %276, %253 : vector<4x32xf32>
    %280 = arith.mulf %275, %277 : vector<4x32xf32>
    %281 = arith.addf %279, %280 : vector<4x32xf32>
    %282 = math.tanh %281 : vector<4x32xf32>
    %283 = arith.mulf %278, %282 : vector<4x32xf32>
    %284 = vector.broadcast %c7_i32 : i32 to vector<4x1xi32>
    %285 = arith.cmpi slt, %284, %8 : vector<4x1xi32>
    %286 = vector.shape_cast %285 : vector<4x1xi1> to vector<4x1xi1>
    %287 = vector.broadcast %286 : vector<4x1xi1> to vector<4x32xi1>
    %288 = arith.select %287, %281, %253 : vector<4x32xi1>, vector<4x32xf32>
    %289 = vector.shape_cast %285 : vector<4x1xi1> to vector<4x1xi1>
    %290 = vector.broadcast %289 : vector<4x1xi1> to vector<4x32xi1>
    %291 = arith.select %290, %283, %256 : vector<4x32xi1>, vector<4x32xf32>
    %cst_52 = arith.constant 0.000000e+00 : f32
    %292 = vector.shape_cast %285 : vector<4x1xi1> to vector<4x1xi1>
    %293 = vector.broadcast %292 : vector<4x1xi1> to vector<4x32xi1>
    %294 = vector.broadcast %cst_52 : f32 to vector<4x32xf32>
    %295 = arith.select %293, %283, %294 : vector<4x32xi1>, vector<4x32xf32>
    %296 = arith.maximumf %261, %295 : vector<4x32xf32>
    %c8_i32 = arith.constant 8 : i32
    %c0_53 = arith.constant 0 : index
    %c0_54 = arith.constant 0 : index
    %297 = vector.load %arg5[%c0_53, %c0_54] : memref<32x5xf32, #tpu.memory_space<vmem>>, vector<32x5xf32>
    %cst_55 = arith.constant dense<0.000000e+00> : vector<4x5xf32>
    %298 = tpu.matmul %296, %297, %cst_55 {dimension_numbers = #tpu.dot_dimension_numbers<[1], [0], [0], [1], [0, 0, 1, 1], [], []>} : vector<4x32xf32>, vector<32x5xf32>, vector<4x5xf32> -> vector<4x5xf32>
    %c0_56 = arith.constant 0 : index
    %c0_57 = arith.constant 0 : index
    %299 = vector.load %arg6[%c0_56, %c0_57] : memref<1x5xf32, #tpu.memory_space<vmem>>, vector<1x5xf32>
    %300 = vector.broadcast %299 : vector<1x5xf32> to vector<4x5xf32>
    %301 = arith.addf %298, %300 : vector<4x5xf32>
    %c0_58 = arith.constant 0 : index
    %c0_59 = arith.constant 0 : index
    %302 = vector.load %arg7[%c0_58, %c0_59] : memref<4x5xf32, #tpu.memory_space<vmem>>, vector<4x5xf32>
    tpu.vector_store %arg7[%c0_58, %c0_59], %301 {strides = array<i32>} : memref<4x5xf32, #tpu.memory_space<vmem>>, vector<4x5xf32>,
    return
  }
}

</mosaic_0001>

<bundles_post_ra>
// kernel: lstm_forward.1
= control target key start
LH: loop header
LB: loop body
LE: loop exit
PB: predicated region body
PF: predicated region fallthrough
CT: control target
= control target key end

     0   :  { %vm40_vm0 = vcmask 130048   ;;  %v1489_v4 = vmov 0.0|0.0   ;;  %vm1490_vm1 = vmmov 0   ;;  %v1491_v10 = vmov 0.0   ;;  %s1771_s0 = inlined_call_operand.vmem [shape: f32[32,16], index: 0, kind: input, shape index: {}]   ;;  %s1772_s1 = inlined_call_operand.vmem [shape: s32[4,1], index: 1, kind: input, shape index: {}]   ;;  %s1773_s2 = inlined_call_operand.vmem [shape: f32[16,128], index: 2, kind: input, shape index: {}]   ;;  %s1774_s3 = inlined_call_operand.vmem [shape: f32[32,128], index: 3, kind: input, shape index: {}]   ;;  %s1775_s4 = inlined_call_operand.vmem [shape: f32[1,128], index: 4, kind: input, shape index: {}]   ;;  %s1776_s5 = inlined_call_operand.vmem [shape: f32[32,5], index: 5, kind: input, shape index: {}]   ;;  %s1777_s6 = inlined_call_operand.vmem [shape: f32[1,5], index: 6, kind: input, shape index: {}]   ;;  %s1778_s7 = inlined_call_operand.hbm [shape: f32[4,5], index: 7, kind: output, shape index: {}]  }
   0x1   :  { %v31_v0 = vld [vmem:[%s1773_s2] sm:$0xff]  ;;  %v32_v1 = vld [vmem:[%s1773_s2 + $0x8] sm:$0xff]  ;;  %1338 = vmatprep.subr.bf16.mxu1 %v1489_v4  ;;  %v144_v8 = vld [vmem:[%s1774_s3 + $0x10] sm:$0xff]  ;;  %1243 = vmatprep.mubr.msk.f32.mxu1 %vm1490_vm1, %v1491_v10 }
   0x2   :  { %v27_v2 = vld [vmem:[%s1771_s0] sm:$0xff]  ;;  %v1334_v3 = vpack.c.bf16 %v32_v1, %v31_v0  ;;  %v143_v6 = vld [vmem:[%s1774_s3 + $0x8] sm:$0xff]  ;;  %v145_v9 = vld [vmem:[%s1774_s3 + $0x18] sm:$0xff] }
   0x3   :  { %1229 = vmatprep.mubr.msk.f32.mxu0 %vm40_vm0, %v27_v2  ;;  %v142_v5 = vld [vmem:[%s1774_s3] sm:$0xff] }
   0x4   :  { %v1553_v7 = vpack.c.bf16 %v143_v6, %v142_v5 }
   0x5   :  { %12 = vsyncpa [#allocation4], 0  ;;  %1335 = vmatprep.subr.bf16.mxu0 %v1334_v3  ;;  %v28_v11 = vld [vmem:[%s1771_s0 + $0x8] sm:$0xff]  ;;  %v1567_v12 = vpack.c.bf16 %v145_v9, %v144_v8  ;;  %v1588_v13 = vld [vmem:[%s1772_s1] sm:$0xf]  ;;  %v1492_v14 = vmov 0   ;;  %v147_v27 = vlaneseq }
   0x6   :  { %1337 = vmatpush3.bf16.msra.mxu0 %v1334_v3  ;;  %1340 = vmatpush3.bf16.msra.mxu1 %v1553_v7  ;;  %vm253_vm2 = vcmp.gt.s32.totalorder %v1588_v13, 0  ;;  %v1152_v16 = vld [vmem:[%s1775_s4] ss:$0 sm:$0xff]  ;;  %s1493_s1 = smov 64   ;;  %s1494_s4 = smov 32   ;;  %v29_v39 = vld [vmem:[%s1771_s0 + $0x10] sm:$0xff] }
   0x7   :  { %1341 = vmatprep.subr.bf16.mxu1 %v1489_v4  ;;  %1344 = vmatprep.subr.bf16.mxu0 %v1489_v4  ;;  %v254_v15 = vsel %vm253_vm2, 1, %v1492_v14  ;;  %v148_v29 = vand.u32 127, %v147_v27  ;;  %v30_v40 = vld [vmem:[%s1771_s0 + $0x18] sm:$0xff]  ;;  %vm153_vm7 = vcmask 261120   ;;  %vm364_vm8 = vcmp.gt.s32.totalorder %v1588_v13, 1  ;;  %v1051_v30 = vld [vmem:[%s1776_s5 + $0x8] sm:$0xff] }
   0x8   :  { %1399 = vset.pattern.permute.xlu1 %v1492_v14  ;;  %1400 = vset.pattern.permute.xlu0 %v1492_v14  ;;  %v365_v61 = vsel %vm364_vm8, 1, %v1492_v14  ;;  %vm477_vm10 = vcmp.gt.s32.totalorder %v1588_v13, 2  ;;  %vm590_vm12 = vcmp.gt.s32.totalorder %v1588_v13, 3  ;;  %vm703_vm14 = vcmp.gt.s32.totalorder %v1588_v13, 4  ;;  %s1495_s8 = smov [#allocation3]  }
   0x9   :  { %1230 = vmatmul.mubr.msk.f32.vlgmr.msra.gmra.mrb[0].mxu0 %vm40_vm0, %v28_v11  ;;  %256 = vperm.xlu1 %1399, %v254_v15   ;;  %vm149_vm3 = vcmp.ge.s32.totalorder %v148_v29, 64  ;;  %vm150_vm4 = vcmp.lt.s32.totalorder %v148_v29, 96  ;;  %s1144_s9 = sshll.u32 %s1495_s8, 4  ;;  %s1145_s9 = int_to_ptr.vmem [resolvable:$true] %s1144_s9 }
   0xa   :  { %1343 = vmatpush3.bf16.msra.mxu1 %v1567_v12  ;;  %1346 = vmatpush3.bf16.msra.mxu0 %v1553_v7  ;;  %vm1597_vm5 = vmand %vm149_vm3, %vm150_vm4  ;;  %vm929_vm3 = vcmp.gt.s32.totalorder %v1588_v13, 6  ;;  %vm1042_vm4 = vcmp.gt.s32.totalorder %v1588_v13, 7  ;;  %s1465_s10 = scalar_lea.vmem %s1145_s9, 64  ;;  %p1470_p1 = scmp.lt.s32.totalorder %s1145_s9, %s1145_s9 }
   0xb   :  { %1347 = vmatprep.subr.bf16.mxu0 %v1489_v4  ;;  %1350 = vmatprep.subr.bf16.mxu1 %v1489_v4  ;;  %p1466_p0 = scmp.ne.s32.totalorder %s1145_s9, %s1465_s10  ;;  %p1471_p2 = scmp.lt.s32.totalorder %s1465_s10, %s1465_s10 }
   0xc   :  { %1232 = vmatprep.mubr.msk.f32.mxu0 %vm40_vm0, %v29_v39 }
   0xd   :  { %1244 = vmatmul.mubr.f32.vlgmr.msra.gmra.mrb[0].mxu1 %v1491_v10  ;;  %1233 = vmatmul.mubr.msk.f32.gmra.mrb[2].mxu0 %vm40_vm0, %v30_v40  ;;  %vm816_vm0 = vcmp.gt.s32.totalorder %v1588_v13, 5  ;;  %v1050_v13 = vld [vmem:[%s1776_s5] sm:$0xff]  ;;  %p1472_p3 = por %p1471_p2, %p1470_p1 }
   0xe   :  { %1349 = vmatpush3.bf16.msra.mxu0 %v1567_v12  ;;  %1352 = vmatpush3.bf16.msra.mxu1 %v1553_v7 }
   0xf   :  { %1353 = vmatprep.subr.bf16.mxu1 %v1489_v4  ;;  %1265 = vmatprep.mubr.msk.f32.mxu1 %vm1490_vm1, %v1491_v10  ;;  %p1473_p4 = pnand %p1472_p3, %p1466_p0 }
  0x10   :  { %1356 = vmatprep.subr.bf16.mxu0 %v1489_v4  ;;  %1254 = vmatprep.mubr.msk.f32.mxu0 %vm1490_vm1, %v1491_v10 }
  0x12   :  { %1355 = vmatpush3.bf16.msra.mxu1 %v1567_v12 }
  0x13   :  { %1362 = vmatprep.subr.bf16.mxu1 %v1489_v4 }
  0x88   :  { %v257_v42 = vpop.permute.xlu1 %256 }
  0x89   :  { %vm258_vm6 = vcmp.eq.s32.totalorder %v257_v42, 1 }
  0xdc   :  { %v1231_v17 = vpop.f32.mrb[0].mxu0 }
  0xdd   :  { %v125_v18 = vadd.f32 %v1231_v17, %v1152_v16  ;;  %v119_v19 = vpop.f32.mrb[1].mxu0 }
  0xde   :  { %v120_v20 = vadd.f32 %v1152_v16, %v119_v19 }
  0xdf   :  { %139 = vst [vmem:[#allocation2 + $0x8] sm:$0xff] %v125_v18 }
  0xe0   :  { %138 = vst [vmem:[#allocation2] sm:$0xff] %v120_v20  ;;  %v223_v21 = vpop.f32.mrb[0].mxu1  ;;  %v1234_v46 = vpop.f32.mrb[2].mxu0 }
  0xe1   :  { %v1245_v22 = vpop.f32.mrb[1].mxu1  ;;  %v135_v47 = vadd.f32 %v1234_v46, %v1152_v16  ;;  %v129_v48 = vpop.f32.mrb[3].mxu0 }
  0xe2   :  { %v130_v49 = vadd.f32 %v1152_v16, %v129_v48 }
  0xe3   :  { %141 = vst [vmem:[#allocation2 + $0x18] sm:$0xff] %v135_v47 }
  0xe4   :  { %140 = vst [vmem:[#allocation2 + $0x10] sm:$0xff] %v130_v49 }
  0xe6   :  { %v375_v16 = vld [vmem:[#allocation2 + $0x8] sm:$0xf] }
  0xe7   :  { %v152_v23 = vld [vmem:[#allocation2] sm:$0xf]  ;;  %v262_v51 = vld [vmem:[#allocation2 + $0x4] sm:$0xf] }
  0xe8   :  { %v227_v24 = vadd.f32 %v223_v21, %v152_v23 }
  0xea   :  { %v1157_v25 = vmul.f32 -1.442695, %v227_v24 }
  0xec   :  { %1401 = vpow2.f32 %v1157_v25 }
  0xed   :  { %1403 = vtanh.f32 %v227_v24 }
  0xf6   :  { %v1402_v26 = vpop.eup %1401 }
  0xf7   :  { %v231_v28 = vadd.f32 1.0, %v1402_v26  ;;  %v1404_v31 = vpop.eup %1403  ;;  %v478_v26 = vsel %vm477_vm10, 1, %v1492_v14 }
  0xf9   :  { %1405 = vrcp.f32 %v231_v28 }
 0x103   :  { %v1406_v32 = vpop.eup %1405 }
 0x104   :  { %v235_v33 = vsel %vm1597_vm5, %v1404_v31, %v1406_v32 }
 0x105   :  { %238 = vrot.lane.b32.xlu0 %v235_v33, %s1493_s1  ;;  %v236_v36 = vmul.f32 0.0, %v235_v33 }
 0x177   :  { %v239_v34 = vpop.permute.xlu0 %238 }
 0x178   :  { %v241_v35 = vmul.f32 %v239_v34, %v235_v33 }
 0x17a   :  { %243 = vrot.lane.b32.xlu0 %v241_v35, %s1494_s4 }
 0x1ec   :  { %v244_v37 = vpop.permute.xlu0 %243 }
 0x1ed   :  { %v246_v38 = vadd.f32 %v244_v37, %v236_v36 }
 0x1ef   :  { %1407 = vtanh.f32 %v246_v38  ;;  %v259_v0 = vsel %vm258_vm6, %v246_v38, 0.0 }
 0x1f9   :  { %v1408_v41 = vpop.eup %1407 }
 0x1fa   :  { %249 = vrot.lane.b32.xlu1 %v1408_v41, %s1493_s1 }
 0x26c   :  { %v250_v43 = vpop.permute.xlu1 %249 }
 0x26d   :  { %v252_v44 = vmul.f32 %v250_v43, %v235_v33 }
 0x26f   :  { %v1617_v45 = vsel %vm258_vm6, %v252_v44, 0.0  ;;  %v488_v44 = vld [vmem:[#allocation2 + $0xc] sm:$0xf]  ;;  %vm1136_vm6 = vcmask 35840  }
 0x270   :  { %264 = vrot.lane.b32.xlu0 %v1617_v45, %s1494_s4 }
 0x2e2   :  { %v265_v50 = vpop.permute.xlu0 %264 }
 0x2e3   :  { %1255 = vmatmul.mubr.msk.f32.vlgmr.msra.gmra.mrb[4].mxu0 %vm153_vm7, %v265_v50 }
 0x2e4   :  { %1358 = vmatpush3.bf16.msra.mxu0 %v1553_v7  ;;  %1276 = vmatprep.mubr.msk.f32.mxu0 %vm1490_vm1, %v1491_v10 }
 0x2e5   :  { %1359 = vmatprep.subr.bf16.mxu0 %v1489_v4 }
 0x2e8   :  { %1361 = vmatpush3.bf16.msra.mxu0 %v1567_v12 }
 0x2e9   :  { %1368 = vmatprep.subr.bf16.mxu0 %v1489_v4 }
 0x3b6   :  { %v334_v52 = vpop.f32.mrb[4].mxu0 }
 0x3b7   :  { %v338_v53 = vadd.f32 %v334_v52, %v262_v51  ;;  %v1256_v54 = vpop.f32.mrb[5].mxu0 }
 0x3b8   :  { %v591_v54 = vsel %vm590_vm12, 1, %v1492_v14 }
 0x3b9   :  { %v1159_v55 = vmul.f32 -1.442695, %v338_v53 }
 0x3bb   :  { %1409 = vpow2.f32 %v1159_v55 }
 0x3bc   :  { %1411 = vtanh.f32 %v338_v53 }
 0x3c5   :  { %v1410_v56 = vpop.eup %1409 }
 0x3c6   :  { %v342_v57 = vadd.f32 1.0, %v1410_v56  ;;  %v1412_v58 = vpop.eup %1411 }
 0x3c8   :  { %1413 = vrcp.f32 %v342_v57 }
 0x3d2   :  { %v1414_v59 = vpop.eup %1413 }
 0x3d3   :  { %v346_v60 = vsel %vm1597_vm5, %v1412_v58, %v1414_v59 }
 0x3d4   :  { %349 = vrot.lane.b32.xlu1 %v346_v60, %s1493_s1  ;;  %v347_v1 = vmul.f32 %v346_v60, %v259_v0 }
 0x3d8   :  { %367 = vperm.xlu1 %1399, %v365_v61  }
 0x446   :  { %v350_v62 = vpop.permute.xlu1 %349 }
 0x447   :  { %v352_v63 = vmul.f32 %v350_v62, %v346_v60 }
 0x449   :  { %354 = vrot.lane.b32.xlu0 %v352_v63, %s1494_s4 }
 0x457   :  { %v368_v6 = vpop.permute.xlu1 %367 }
 0x458   :  { %vm369_vm9 = vcmp.eq.s32.totalorder %v368_v6, 1  ;;  %v601_v6 = vld [vmem:[#allocation2 + $0x10] sm:$0xf] }
 0x4bb   :  { %v355_v2 = vpop.permute.xlu0 %354 }
 0x4bc   :  { %v357_v3 = vadd.f32 %v355_v2, %v347_v1 }
 0x4be   :  { %1415 = vtanh.f32 %v357_v3  ;;  %v370_v29 = vsel %vm369_vm9, %v357_v3, %v259_v0 }
 0x4c8   :  { %v1416_v5 = vpop.eup %1415 }
 0x4c9   :  { %360 = vrot.lane.b32.xlu0 %v1416_v5, %s1493_s1 }
 0x53b   :  { %v361_v8 = vpop.permute.xlu0 %360 }
 0x53c   :  { %v363_v9 = vmul.f32 %v361_v8, %v346_v60 }
 0x53e   :  { %v371_v11 = vsel %vm369_vm9, %v363_v9, %v1617_v45  ;;  %v372_v35 = vsel %vm369_vm9, %v363_v9, 0.0 }
 0x53f   :  { %377 = vrot.lane.b32.xlu1 %v371_v11, %s1494_s4  ;;  %v373_v39 = vmax.f32 %v1617_v45, %v372_v35 }
 0x5b1   :  { %v378_v15 = vpop.permute.xlu1 %377 }
 0x5b2   :  { %1266 = vmatmul.mubr.msk.f32.vlgmr.msra.gmra.mrb[2].mxu1 %vm153_vm7, %v378_v15 }
 0x5b3   :  { %1364 = vmatpush3.bf16.msra.mxu1 %v1553_v7  ;;  %1287 = vmatprep.mubr.msk.f32.mxu1 %vm1490_vm1, %v1491_v10 }
 0x5b4   :  { %1365 = vmatprep.subr.bf16.mxu1 %v1489_v4 }
 0x5b7   :  { %1367 = vmatpush3.bf16.msra.mxu1 %v1567_v12 }
 0x5b8   :  { %1374 = vmatprep.subr.bf16.mxu1 %v1489_v4 }
 0x685   :  { %v447_v17 = vpop.f32.mrb[2].mxu1 }
 0x686   :  { %v451_v18 = vadd.f32 %v447_v17, %v375_v16  ;;  %v1267_v19 = vpop.f32.mrb[3].mxu1 }
 0x688   :  { %v1161_v20 = vmul.f32 -1.442695, %v451_v18 }
 0x68a   :  { %1417 = vpow2.f32 %v1161_v20 }
 0x68b   :  { %1419 = vtanh.f32 %v451_v18 }
 0x694   :  { %v1418_v21 = vpop.eup %1417 }
 0x695   :  { %v455_v22 = vadd.f32 1.0, %v1418_v21  ;;  %v1420_v23 = vpop.eup %1419  ;;  %v704_v21 = vsel %vm703_vm14, 1, %v1492_v14 }
 0x697   :  { %1421 = vrcp.f32 %v455_v22 }
 0x6a1   :  { %v1422_v24 = vpop.eup %1421 }
 0x6a2   :  { %v459_v25 = vsel %vm1597_vm5, %v1420_v23, %v1422_v24 }
 0x6a3   :  { %462 = vrot.lane.b32.xlu0 %v459_v25, %s1493_s1  ;;  %v460_v31 = vmul.f32 %v459_v25, %v370_v29 }
 0x6a7   :  { %480 = vperm.xlu0 %1400, %v478_v26  }
 0x715   :  { %v463_v27 = vpop.permute.xlu0 %462 }
 0x716   :  { %v465_v28 = vmul.f32 %v463_v27, %v459_v25 }
 0x718   :  { %467 = vrot.lane.b32.xlu1 %v465_v28, %s1494_s4 }
 0x726   :  { %v481_v36 = vpop.permute.xlu0 %480 }
 0x727   :  { %vm482_vm11 = vcmp.eq.s32.totalorder %v481_v36, 1 }
 0x78a   :  { %v468_v32 = vpop.permute.xlu1 %467 }
 0x78b   :  { %v470_v33 = vadd.f32 %v468_v32, %v460_v31 }
 0x78d   :  { %1423 = vtanh.f32 %v470_v33  ;;  %v483_v57 = vsel %vm482_vm11, %v470_v33, %v370_v29 }
 0x797   :  { %v1424_v34 = vpop.eup %1423 }
 0x798   :  { %473 = vrot.lane.b32.xlu1 %v1424_v34, %s1493_s1 }
 0x80a   :  { %v474_v37 = vpop.permute.xlu1 %473 }
 0x80b   :  { %v476_v38 = vmul.f32 %v474_v37, %v459_v25  ;;  %v714_v37 = vld [vmem:[#allocation2 + $0x14] sm:$0xf] }
 0x80d   :  { %v485_v40 = vsel %vm482_vm11, %v476_v38, 0.0  ;;  %v484_v41 = vsel %vm482_vm11, %v476_v38, %v371_v11 }
 0x80e   :  { %v1658_v42 = vmax.f32 %v373_v39, %v485_v40  ;;  %490 = vrot.lane.b32.xlu1 %v484_v41, %s1494_s4 }
 0x880   :  { %v491_v43 = vpop.permute.xlu1 %490 }
 0x881   :  { %1277 = vmatmul.mubr.msk.f32.vlgmr.msra.gmra.mrb[6].mxu0 %vm153_vm7, %v491_v43 }
 0x882   :  { %1370 = vmatpush3.bf16.msra.mxu0 %v1553_v7  ;;  %1298 = vmatprep.mubr.msk.f32.mxu0 %vm1490_vm1, %v1491_v10 }
 0x883   :  { %1371 = vmatprep.subr.bf16.mxu0 %v1489_v4 }
 0x886   :  { %1373 = vmatpush3.bf16.msra.mxu0 %v1567_v12 }
 0x887   :  { %1380 = vmatprep.subr.bf16.mxu0 %v1489_v4 }
 0x954   :  { %v560_v45 = vpop.f32.mrb[6].mxu0 }
 0x955   :  { %v564_v46 = vadd.f32 %v560_v45, %v488_v44  ;;  %v1278_v47 = vpop.f32.mrb[7].mxu0 }
 0x957   :  { %v1163_v48 = vmul.f32 -1.442695, %v564_v46 }
 0x959   :  { %1425 = vpow2.f32 %v1163_v48 }
 0x95a   :  { %1427 = vtanh.f32 %v564_v46 }
 0x963   :  { %v1426_v49 = vpop.eup %1425 }
 0x964   :  { %v568_v50 = vadd.f32 1.0, %v1426_v49  ;;  %v1428_v51 = vpop.eup %1427 }
 0x966   :  { %1429 = vrcp.f32 %v568_v50 }
 0x970   :  { %v1430_v52 = vpop.eup %1429 }
 0x971   :  { %v572_v53 = vsel %vm1597_vm5, %v1428_v51, %v1430_v52 }
 0x972   :  { %575 = vrot.lane.b32.xlu0 %v572_v53, %s1493_s1  ;;  %v573_v58 = vmul.f32 %v572_v53, %v483_v57 }
 0x976   :  { %593 = vperm.xlu0 %1400, %v591_v54  }
 0x9e4   :  { %v576_v55 = vpop.permute.xlu0 %575 }
 0x9e5   :  { %v578_v56 = vmul.f32 %v576_v55, %v572_v53 }
 0x9e7   :  { %580 = vrot.lane.b32.xlu1 %v578_v56, %s1494_s4 }
 0x9f5   :  { %v594_v62 = vpop.permute.xlu0 %593 }
 0x9f6   :  { %vm595_vm13 = vcmp.eq.s32.totalorder %v594_v62, 1 }
 0xa59   :  { %v581_v59 = vpop.permute.xlu1 %580 }
 0xa5a   :  { %v583_v60 = vadd.f32 %v581_v59, %v573_v58 }
 0xa5c   :  { %1431 = vtanh.f32 %v583_v60  ;;  %v596_v24 = vsel %vm595_vm13, %v583_v60, %v483_v57  ;;  %v827_v60 = vld [vmem:[#allocation2 + $0x18] sm:$0xf] }
 0xa66   :  { %v1432_v61 = vpop.eup %1431 }
 0xa67   :  { %586 = vrot.lane.b32.xlu1 %v1432_v61, %s1493_s1 }
 0xad9   :  { %v587_v63 = vpop.permute.xlu1 %586 }
 0xada   :  { %v589_v0 = vmul.f32 %v587_v63, %v572_v53 }
 0xadc   :  { %v598_v1 = vsel %vm595_vm13, %v589_v0, 0.0  ;;  %v597_v2 = vsel %vm595_vm13, %v589_v0, %v484_v41 }
 0xadd   :  { %v599_v3 = vmax.f32 %v1658_v42, %v598_v1  ;;  %603 = vrot.lane.b32.xlu0 %v597_v2, %s1494_s4 }
 0xb4f   :  { %v604_v5 = vpop.permute.xlu0 %603 }
 0xb50   :  { %1288 = vmatmul.mubr.msk.f32.vlgmr.msra.gmra.mrb[4].mxu1 %vm153_vm7, %v604_v5 }
 0xb51   :  { %1376 = vmatpush3.bf16.msra.mxu1 %v1553_v7  ;;  %1309 = vmatprep.mubr.msk.f32.mxu1 %vm1490_vm1, %v1491_v10 }
 0xb52   :  { %1377 = vmatprep.subr.bf16.mxu1 %v1489_v4 }
 0xb55   :  { %1379 = vmatpush3.bf16.msra.mxu1 %v1567_v12 }
 0xb56   :  { %1386 = vmatprep.subr.bf16.mxu1 %v1489_v4 }
 0xc23   :  { %v673_v8 = vpop.f32.mrb[4].mxu1 }
 0xc24   :  { %v677_v9 = vadd.f32 %v673_v8, %v601_v6  ;;  %v1289_v11 = vpop.f32.mrb[5].mxu1 }
 0xc26   :  { %v1165_v15 = vmul.f32 -1.442695, %v677_v9 }
 0xc28   :  { %1433 = vpow2.f32 %v1165_v15 }
 0xc29   :  { %1435 = vtanh.f32 %v677_v9 }
 0xc32   :  { %v1434_v16 = vpop.eup %1433 }
 0xc33   :  { %v681_v17 = vadd.f32 1.0, %v1434_v16  ;;  %v1436_v18 = vpop.eup %1435 }
 0xc35   :  { %1437 = vrcp.f32 %v681_v17 }
 0xc3f   :  { %v1438_v19 = vpop.eup %1437 }
 0xc40   :  { %v685_v20 = vsel %vm1597_vm5, %v1436_v18, %v1438_v19 }
 0xc41   :  { %688 = vrot.lane.b32.xlu1 %v685_v20, %s1493_s1  ;;  %v686_v25 = vmul.f32 %v685_v20, %v596_v24 }
 0xc45   :  { %706 = vperm.xlu1 %1399, %v704_v21  }
 0xcb3   :  { %v689_v22 = vpop.permute.xlu1 %688 }
 0xcb4   :  { %v691_v23 = vmul.f32 %v689_v22, %v685_v20 }
 0xcb6   :  { %693 = vrot.lane.b32.xlu0 %v691_v23, %s1494_s4 }
 0xcc4   :  { %v707_v29 = vpop.permute.xlu1 %706 }
 0xcc5   :  { %vm708_vm15 = vcmp.eq.s32.totalorder %v707_v29, 1 }
 0xd28   :  { %v694_v26 = vpop.permute.xlu0 %693 }
 0xd29   :  { %v696_v27 = vadd.f32 %v694_v26, %v686_v25  ;;  %v940_v26 = vld [vmem:[#allocation2 + $0x1c] sm:$0xf] }
 0xd2b   :  { %1439 = vtanh.f32 %v696_v27  ;;  %v709_v48 = vsel %vm708_vm15, %v696_v27, %v596_v24 }
 0xd35   :  { %v1440_v28 = vpop.eup %1439 }
 0xd36   :  { %699 = vrot.lane.b32.xlu0 %v1440_v28, %s1493_s1 }
 0xda8   :  { %v700_v31 = vpop.permute.xlu0 %699 }
 0xda9   :  { %v702_v32 = vmul.f32 %v700_v31, %v685_v20 }
 0xdab   :  { %v711_v33 = vsel %vm708_vm15, %v702_v32, 0.0  ;;  %v710_v34 = vsel %vm708_vm15, %v702_v32, %v597_v2 }
 0xdac   :  { %v1697_v35 = vmax.f32 %v599_v3, %v711_v33  ;;  %716 = vrot.lane.b32.xlu1 %v710_v34, %s1494_s4 }
 0xe1e   :  { %v717_v36 = vpop.permute.xlu1 %716 }
 0xe1f   :  { %1299 = vmatmul.mubr.msk.f32.vlgmr.msra.gmra.mrb[8].mxu0 %vm153_vm7, %v717_v36 }
 0xe20   :  { %1382 = vmatpush3.bf16.msra.mxu0 %v1553_v7  ;;  %1320 = vmatprep.mubr.msk.f32.mxu0 %vm1490_vm1, %v1491_v10 }
 0xe21   :  { %1383 = vmatprep.subr.bf16.mxu0 %v1489_v4 }
 0xe24   :  { %1385 = vmatpush3.bf16.msra.mxu0 %v1567_v12  ;;  %v817_v12 = vsel %vm816_vm0, 1, %v1492_v14 }
 0xef2   :  { %v786_v38 = vpop.f32.mrb[8].mxu0 }
 0xef3   :  { %v790_v39 = vadd.f32 %v786_v38, %v714_v37  ;;  %v1300_v40 = vpop.f32.mrb[9].mxu0  ;;  %v1043_v37 = vsel %vm1042_vm4, 1, %v1492_v14 }
 0xef5   :  { %v1167_v41 = vmul.f32 -1.442695, %v790_v39 }
 0xef7   :  { %1441 = vpow2.f32 %v1167_v41 }
 0xef8   :  { %1443 = vtanh.f32 %v790_v39 }
 0xf01   :  { %v1442_v42 = vpop.eup %1441 }
 0xf02   :  { %v794_v43 = vadd.f32 1.0, %v1442_v42  ;;  %v1444_v44 = vpop.eup %1443 }
 0xf04   :  { %1445 = vrcp.f32 %v794_v43 }
 0xf0e   :  { %v1446_v45 = vpop.eup %1445 }
 0xf0f   :  { %v798_v7 = vsel %vm1597_vm5, %v1444_v44, %v1446_v45  ;;  %v1387_v44 = vpack.c.bf16 %v1051_v30, %v1050_v13  ;;  %v1053_v45 = vld [vmem:[%s1776_s5 + $0x18] sm:$0xff] }
 0xf10   :  { %801 = vrot.lane.b32.xlu0 %v798_v7, %s1493_s1  ;;  %v799_v49 = vmul.f32 %v798_v7, %v709_v48 }
 0xf14   :  { %819 = vperm.xlu0 %1400, %v817_v12  }
 0xf82   :  { %v802_v46 = vpop.permute.xlu0 %801 }
 0xf83   :  { %v804_v47 = vmul.f32 %v802_v46, %v798_v7 }
 0xf85   :  { %806 = vrot.lane.b32.xlu1 %v804_v47, %s1494_s4 }
 0xf93   :  { %v820_v53 = vpop.permute.xlu0 %819 }
 0xf94   :  { %vm821_vm2 = vcmp.eq.s32.totalorder %v820_v53, 1 }
 0xff7   :  { %v807_v50 = vpop.permute.xlu1 %806 }
 0xff8   :  { %v809_v51 = vadd.f32 %v807_v50, %v799_v49 }
 0xffa   :  { %1447 = vtanh.f32 %v809_v51  ;;  %v822_v11 = vsel %vm821_vm2, %v809_v51, %v709_v48 }
0x1004   :  { %v1448_v52 = vpop.eup %1447 }
0x1005   :  { %812 = vrot.lane.b32.xlu1 %v1448_v52, %s1493_s1  ;;  %v1172_v52 = vld [vmem:[%s1777_s6] ss:$0 sm:$0xff] }
0x1077   :  { %v813_v54 = vpop.permute.xlu1 %812 }
0x1078   :  { %v815_v55 = vmul.f32 %v813_v54, %v798_v7 }
0x107a   :  { %v824_v56 = vsel %vm821_vm2, %v815_v55, 0.0  ;;  %v823_v57 = vsel %vm821_vm2, %v815_v55, %v710_v34 }
0x107b   :  { %v825_v58 = vmax.f32 %v1697_v35, %v824_v56  ;;  %829 = vrot.lane.b32.xlu0 %v823_v57, %s1494_s4 }
0x10ed   :  { %v830_v59 = vpop.permute.xlu0 %829 }
0x10ee   :  { %1310 = vmatmul.mubr.msk.f32.vlgmr.msra.gmra.mrb[6].mxu1 %vm153_vm7, %v830_v59 }
0x10ef   :  { %1331 = vmatprep.mubr.msk.f32.mxu1 %vm1490_vm1, %v1491_v10  ;;  %v930_v10 = vsel %vm929_vm3, 1, %v1492_v14  ;;  %v1052_v14 = vld [vmem:[%s1776_s5 + $0x10] sm:$0xff]  ;;  %1388 = vmatpush3.bf16.msra.mxu1 %v1387_v44 }
0x10f0   :  { %v1390_v7 = vpack.c.bf16 %v1053_v45, %v1052_v14  ;;  %1389 = vmatprep.subr.bf16.mxu1 %v1489_v4 }
0x10f3   :  { %1391 = vmatpush3.bf16.msra.mxu1 %v1390_v7 }
0x11c1   :  { %v899_v61 = vpop.f32.mrb[6].mxu1 }
0x11c2   :  { %v903_v62 = vadd.f32 %v899_v61, %v827_v60  ;;  %v1311_v63 = vpop.f32.mrb[7].mxu1 }
0x11c4   :  { %v1169_v0 = vmul.f32 -1.442695, %v903_v62 }
0x11c6   :  { %1449 = vpow2.f32 %v1169_v0 }
0x11c7   :  { %1451 = vtanh.f32 %v903_v62 }
0x11d0   :  { %v1450_v1 = vpop.eup %1449 }
0x11d1   :  { %v907_v2 = vadd.f32 1.0, %v1450_v1  ;;  %v1452_v3 = vpop.eup %1451 }
0x11d3   :  { %1453 = vrcp.f32 %v907_v2 }
0x11dd   :  { %v1454_v5 = vpop.eup %1453 }
0x11de   :  { %v911_v6 = vsel %vm1597_vm5, %v1452_v3, %v1454_v5 }
0x11df   :  { %914 = vrot.lane.b32.xlu1 %v911_v6, %s1493_s1  ;;  %v912_v15 = vmul.f32 %v911_v6, %v822_v11 }
0x11e3   :  { %932 = vperm.xlu1 %1399, %v930_v10  }
0x1251   :  { %v915_v8 = vpop.permute.xlu1 %914 }
0x1252   :  { %v917_v9 = vmul.f32 %v915_v8, %v911_v6 }
0x1254   :  { %919 = vrot.lane.b32.xlu0 %v917_v9, %s1494_s4 }
0x1262   :  { %v933_v19 = vpop.permute.xlu1 %932 }
0x1263   :  { %vm934_vm1 = vcmp.eq.s32.totalorder %v933_v19, 1 }
0x12c6   :  { %v920_v16 = vpop.permute.xlu0 %919 }
0x12c7   :  { %v922_v17 = vadd.f32 %v920_v16, %v912_v15 }
0x12c9   :  { %1455 = vtanh.f32 %v922_v17  ;;  %v935_v40 = vsel %vm934_vm1, %v922_v17, %v822_v11 }
0x12d3   :  { %v1456_v18 = vpop.eup %1455 }
0x12d4   :  { %925 = vrot.lane.b32.xlu0 %v1456_v18, %s1493_s1 }
0x1346   :  { %v926_v20 = vpop.permute.xlu0 %925 }
0x1347   :  { %v928_v21 = vmul.f32 %v926_v20, %v911_v6 }
0x1349   :  { %v937_v22 = vsel %vm934_vm1, %v928_v21, 0.0  ;;  %v936_v23 = vsel %vm934_vm1, %v928_v21, %v823_v57 }
0x134a   :  { %v938_v24 = vmax.f32 %v825_v58, %v937_v22  ;;  %942 = vrot.lane.b32.xlu1 %v936_v23, %s1494_s4 }
0x13bc   :  { %v943_v25 = vpop.permute.xlu1 %942 }
0x13bd   :  { %1321 = vmatmul.mubr.msk.f32.vlgmr.msra.gmra.mrb[10].mxu0 %vm153_vm7, %v943_v25 }
0x1490   :  { %v1012_v27 = vpop.f32.mrb[10].mxu0 }
0x1491   :  { %v1016_v28 = vadd.f32 %v1012_v27, %v940_v26  ;;  %v1322_v29 = vpop.f32.mrb[11].mxu0 }
0x1493   :  { %v1171_v31 = vmul.f32 -1.442695, %v1016_v28 }
0x1495   :  { %1457 = vpow2.f32 %v1171_v31 }
0x1496   :  { %1459 = vtanh.f32 %v1016_v28 }
0x149f   :  { %v1458_v32 = vpop.eup %1457 }
0x14a0   :  { %v1020_v33 = vadd.f32 1.0, %v1458_v32  ;;  %v1460_v34 = vpop.eup %1459 }
0x14a2   :  { %1461 = vrcp.f32 %v1020_v33 }
0x14ac   :  { %v1462_v35 = vpop.eup %1461 }
0x14ad   :  { %v1024_v36 = vsel %vm1597_vm5, %v1460_v34, %v1462_v35 }
0x14ae   :  { %1027 = vrot.lane.b32.xlu0 %v1024_v36, %s1493_s1  ;;  %v1025_v41 = vmul.f32 %v1024_v36, %v935_v40 }
0x14b2   :  { %1045 = vperm.xlu0 %1400, %v1043_v37  }
0x1520   :  { %v1028_v38 = vpop.permute.xlu0 %1027 }
0x1521   :  { %v1030_v39 = vmul.f32 %v1028_v38, %v1024_v36 }
0x1523   :  { %1032 = vrot.lane.b32.xlu1 %v1030_v39, %s1494_s4 }
0x1531   :  { %v1046_v46 = vpop.permute.xlu0 %1045 }
0x1532   :  { %vm1047_vm5 = vcmp.eq.s32.totalorder %v1046_v46, 1 }
0x1595   :  { %v1033_v42 = vpop.permute.xlu1 %1032 }
0x1596   :  { %v1035_v43 = vadd.f32 %v1033_v42, %v1025_v41 }
0x1598   :  { %1463 = vtanh.f32 %v1035_v43 }
0x15a2   :  { %v1464_v12 = vpop.eup %1463 }
0x15a3   :  { %1038 = vrot.lane.b32.xlu1 %v1464_v12, %s1493_s1 }
0x1615   :  { %v1039_v47 = vpop.permute.xlu1 %1038 }
0x1616   :  { %v1041_v48 = vmul.f32 %v1039_v47, %v1024_v36 }
0x1618   :  { %v1048_v49 = vsel %vm1047_vm5, %v1041_v48, 0.0 }
0x1619   :  { %v1049_v50 = vmax.f32 %v938_v24, %v1048_v49 }
0x161b   :  { %1062 = vrot.lane.b32.xlu0 %v1049_v50, %s1494_s4 }
0x168d   :  { %v1063_v51 = vpop.permute.xlu0 %1062 }
0x168e   :  { %1332 = vmatmul.mubr.msk.f32.vlgmr.msra.gmra.mrb[8].mxu1 %vm153_vm7, %v1063_v51 }
0x1761   :  { %v1132_v4 = vpop.f32.mrb[8].mxu1 }
0x1762   :  { %v1133_v53 = vadd.f32 %v1172_v52, %v1132_v4  ;;  %v1333_v54 = vpop.f32.mrb[9].mxu1 }
0x1764   :  { %1137 = vst.msk [vmem:[#allocation3] sm:$0xf] %vm1136_vm6, %v1133_v53 }
0x1765   :  { %1476 = shalt.err (!%p1473_p4)
}
0x1766   :  { %s1477_s12 = scalar_lea.hbm %s1778_s7, 64 }
0x1767   :  { %p1478_p5 = scmp.ne.s32.totalorder %s1778_s7, %s1477_s12  ;;  %p1481_p6 = scmp.lt.u32.totalorder %s1477_s12, %s1778_s7 }
0x1769   :  { %p1483_p7 = pnand %p1481_p6, %p1478_p5 }
0x176b   :  { %1486 = shalt.err (!%p1483_p7)
}
0x176c   :  { %1147 = dma.vmem_to_hbm [thread:$0]  %s1145_s9, 64, %s1778_s7, [#allocation4]  }
0x176d   :  { %1487 = dma.done.wait [#allocation4], 64  }
0x176e   :  { %1488 = vsyncadd [#allocation4], 4294967232 }
0x176f   :  { %1151 = vsyncpa [#allocation4], 1 }

</bundles_post_ra>
